<compile_context>
chip_gen: v7x
topology: tpu7x:2x2x1
jax: 0.10.0
libtpu: 0.0.40
codegen_flags: <defaults>
</compile_context>

<pallas_src>
import functools

import numpy as np
import jax
import jax.numpy as jnp
from jax.experimental import pallas as pl
from jax.experimental.pallas import tpu as pltpu


# ----------------------------------------------------------------------------
# Host-side (numpy) construction of the BWT matrices.
# Reimplements pywt.dwt(..., 'bior1.3', mode='periodization') so the script is
# fully self-contained (no pywt / torch dependency).
# ----------------------------------------------------------------------------
_DEC_LO = np.array([-0.08838834764831845, 0.08838834764831845,
                    0.7071067811865476, 0.7071067811865476,
                    0.08838834764831845, -0.08838834764831845], dtype=np.float64)
_DEC_HI = np.array([0.0, 0.0, -0.7071067811865476,
                    0.7071067811865476, 0.0, 0.0], dtype=np.float64)


def _dwt_periodization(x):
    """Single-level periodized DWT (bior1.3) along the last axis (even length)."""
    N = x.shape[-1]
    F = _DEC_LO.shape[0]
    out_len = (N + 1) // 2
    o = np.arange(out_len)
    j = np.arange(F)
    idx = (F // 2 + 2 * o[:, None] - j[None, :]) % N          # (out_len, F)
    g = x[..., idx]                                           # (..., out_len, F)
    cA = g @ _DEC_LO
    cD = g @ _DEC_HI
    return cA, cD


def _bwt(x):
    cA, cD = _dwt_periodization(x)
    if cA.shape[-1] <= 1:
        return np.concatenate((cA, cD), axis=-1)
    return np.concatenate((_bwt(cA), _bwt(cD)), axis=-1)


def _gray_code(n):
    return [i ^ (i >> 1) for i in range(n)]


def get_bwt_matrix(n):
    return _bwt(np.eye(n))[..., _gray_code(n)]


def find_min_power(n):
    p = 1
    while p < n:
        p *= 2
    return p


def _cdiv(a, b):
    return (a + b - 1) // b


# ----------------------------------------------------------------------------
# Pallas kernel.  One grid step handles Bt batch elements end-to-end.
#
# Ref layouts (S = Hp*Wp flattened row-major h*Wp + w; activation rows ordered (b, c)):
#   x_ref  : (Bt*C_in,  S)        f32   natural NCHW order, just reshaped
#   kf_ref : (S, S)               cdt   kron(H_height, H_width)         (forward transform)
#   kinv_ref:(S, S)               cdt   kron(H_inv_height, H_inv_width) (inverse transform)
#   w_ref  : (pods*C_out, C_in)   cdt   stacked 1x1-conv weights
#   v_ref  : (pods, S)            f32   per-pod spatial scale
#   t_ref  : (pods, S)            f32   per-pod soft threshold (assumed >= 0)
#   o_ref  : (Bt*C_out, S)        f32
# cdt = compute dtype (bf16 by default); all matmuls accumulate in f32; the v-scale,
# soft-threshold, pod-sum and residual add are done in f32.
# ----------------------------------------------------------------------------
def _bwt_conv2d_kernel(x_ref, kf_ref, kinv_ref, w_ref, v_ref, t_ref, o_ref, *,
                       batch_tile, pods, residual, compute_dtype):
    f32 = jnp.float32
    cdt = compute_dtype

    Bt = batch_tile
    S = x_ref.shape[1]
    C = x_ref.shape[0] // Bt
    PO = w_ref.shape[0]          # pods * C_out
    O = PO // pods

    x = x_ref[...]                                            # (Bt*C, S) f32, rows (b, c)

    # ---- forward 2-D BWT: one Kronecker MXU matmul, M = Bt*C, K = N = S ----
    f2 = jnp.dot(x.astype(cdt), kf_ref[...],
                 preferred_element_type=f32)                  # (Bt*C, S) f32

    # ---- stacked 1x1 conv (channel mix) for all pods at once: batched MXU matmul ----
    w_b = jnp.broadcast_to(w_ref[...], (Bt, PO, C))           # tiny, hoisted out of loops
    f4 = jnp.einsum('boc,bcs->bos', w_b,
                    f2.astype(cdt).reshape(Bt, C, S),
                    preferred_element_type=f32)               # (Bt, pods*C_out, S) f32

    # ---- per pod: v-scale AFTER the matmul (f32), soft threshold, sum over pods ----
    acc = None
    for p in range(pods):
        v_p = v_ref[p:p + 1, :].reshape(1, 1, S)              # (1, 1, S) f32
        t_p = t_ref[p:p + 1, :].reshape(1, 1, S)              # (1, 1, S) f32, T >= 0
        z = f4[:, p * O:(p + 1) * O, :] * v_p                 # (Bt, O, S) f32
        st = z - jnp.clip(z, -t_p, t_p)                       # soft threshold, 3 VPU ops
        acc = st if acc is None else acc + st                 # (Bt, O, S) f32

    # ---- inverse 2-D BWT: one Kronecker MXU matmul, M = Bt*C_out ----
    y = jnp.dot(acc.reshape(Bt * O, S).astype(cdt), kinv_ref[...],
                preferred_element_type=f32)                   # (Bt*O, S) f32

    if residual:
        y = y + x                                             # C_out == C_in, same (b,c) order

    o_ref[...] = y.astype(o_ref.dtype)


# ----------------------------------------------------------------------------
# Generation-aware batch-tile selection.
# ----------------------------------------------------------------------------
def _tpu_cores_per_chip():
    try:
        kind = jax.devices()[0].device_kind.lower()
        if ("v7" in kind) or ("tpu7" in kind):
            return 2                                          # v7x: 2 TensorCores / chip
    except Exception:
        pass
    return 1


def _vmem_limit_bytes():
    try:
        phys = int(pltpu.get_tpu_info().vmem_capacity_bytes)
    except Exception:
        phys = 64 * 1024 * 1024                               # v7x worst case
    return min(phys * 3 // 4, 100 * 1024 * 1024)


def _pick_batch_tile(B, per_batch_bytes, budget_bytes, C_in, C_out, cores):
    """Largest batch tile whose working set fits the VMEM budget."""
    bt = max(1, min(B, budget_bytes // max(per_batch_bytes, 1)))
    # Multi-TensorCore chips (v7x): prefer a grid length that splits evenly across cores,
    # but never shrink the tile below Bt*C_in >= 256 (transform-matmul fill/drain amortization).
    if cores > 1 and B > 1:
        lo = max(1, _cdiv(256, C_in))
        if bt >= lo:
            for cand in range(bt, lo - 1, -1):
                if _cdiv(B, cand) % cores == 0:
                    bt = cand
                    break
    bt = min(bt, B)
    # Non-full blocks need a sublane-aligned (x8) second-minor dim.
    if bt < B:
        def ok(b):
            return (b * C_in) % 8 == 0 and (b * C_out) % 8 == 0
        cand = bt
        while cand > 0 and not ok(cand):
            cand -= 1
        bt = cand if cand > 0 else B
    return bt


# ----------------------------------------------------------------------------
# Factory: hoists all constant preprocessing, returns a jitted forward(x).
# ----------------------------------------------------------------------------
def make_bwt_conv2d(params, residual=True, compute_dtype=jnp.bfloat16):
    Hh, Hw = params["H_height"], params["H_width"]
    Hih, Hiw = params["H_inv_height"], params["H_inv_width"]
    v, conv_w, thr = params["v"], params["conv_w"], params["threshold"]

    Hp, Wp = Hh.shape[0], Hw.shape[0]
    S = Hp * Wp
    pods, C_out, C_in = conv_w.shape
    if residual:
        assert C_out == C_in, "residual requires out_channels == in_channels"

    # ---- one-time constant preprocessing (NOT per forward call) ----
    # Kronecker-factored 2-D transforms: a single (S, S) matmul per direction.
    # TODO(synk): keep these in f32 (or go separable) if bf16 accumulation error over S terms
    #             becomes an issue for very large images.
    k_fwd = jnp.kron(Hh.astype(jnp.float32), Hw.astype(jnp.float32)).astype(compute_dtype)
    k_inv = jnp.kron(Hih.astype(jnp.float32), Hiw.astype(jnp.float32)).astype(compute_dtype)
    w_stk = conv_w.reshape(pods * C_out, C_in).astype(compute_dtype)
    v_flat = v.reshape(pods, S).astype(jnp.float32)
    t_flat = thr.reshape(pods, S).astype(jnp.float32)

    cores = _tpu_cores_per_chip()
    vmem_limit = _vmem_limit_bytes()

    cb = jnp.dtype(compute_dtype).itemsize
    resident = (
        2 * (S * S * cb) * 2                 # kf + kinv, x2 pipeline buffers each
        + 2 * (pods * C_out * C_in * cb)     # stacked conv weights
        + 2 * 2 * (pods * S * 4)             # v + threshold (f32)
        + 2 * 1024 * 1024                    # misc compiler scratch slack
    )
    if resident >= vmem_limit:
        raise ValueError(
            f"Kronecker transform matrices ({2 * S * S * cb / 2 ** 20:.1f} MiB) do not fit the "
            f"VMEM budget ({vmem_limit / 2 ** 20:.1f} MiB); use separable transforms instead "
            "(see TODO at top of file).")

    # Conservative per-batch-element VMEM working set (bytes).
    per_batch = S * (
        2 * 4 * C_in            # pipelined input block (x2 buffers), f32
        + 2 * 4 * C_out         # pipelined output block (x2 buffers), f32
        + 4 * C_in              # x value (f32)
        + 2 * C_in              # x cast to compute dtype
        + 4 * C_in              # f2 (f32)
        + 2 * C_in              # f2 cast to compute dtype
        + 4 * pods * C_out      # stacked conv output f4 (f32)
        + 2 * 4 * C_out         # per-pod temp + accumulator (f32)
        + 2 * C_out             # accumulator cast to compute dtype
        + 4 * C_out             # inverse-transform output (f32)
    )
    budget = vmem_limit - resident

    @jax.jit
    def forward(x):
        B, C, H, W = x.shape
        assert C == C_in, f"expected {C_in} input channels, got {C}"
        assert H <= Hp and W <= Wp, f"({H},{W}) exceeds padded ({Hp},{Wp})"

        bt = _pick_batch_tile(B, per_batch, budget, C_in, C_out, cores)
        n_blocks = _cdiv(B, bt)
        B_pad = n_blocks * bt

        # Natural-order layout: rows (b, c), columns s = h*Wp + w.  Free reshapes, no transposes.
        x_p = jnp.pad(x, ((0, B_pad - B), (0, 0), (0, Hp - H), (0, Wp - W)))
        x2 = x_p.reshape(B_pad * C_in, S)

        out = pl.pallas_call(
            functools.partial(_bwt_conv2d_kernel, batch_tile=bt, pods=pods,
                              residual=residual, compute_dtype=compute_dtype),
            out_shape=jax.ShapeDtypeStruct((B_pad * C_out, S), jnp.float32),
            grid=(n_blocks,),
            in_specs=[
                pl.BlockSpec((bt * C_in, S), lambda b: (b, 0)),
                pl.BlockSpec((S, S), lambda b: (0, 0)),
                pl.BlockSpec((S, S), lambda b: (0, 0)),
                pl.BlockSpec((pods * C_out, C_in), lambda b: (0, 0)),
                pl.BlockSpec((pods, S), lambda b: (0, 0)),
                pl.BlockSpec((pods, S), lambda b: (0, 0)),
            ],
            out_specs=pl.BlockSpec((bt * C_out, S), lambda b: (b, 0)),
            compiler_params=pltpu.CompilerParams(
                dimension_semantics=("parallel",),
                vmem_limit_bytes=vmem_limit),
        )(x2, k_fwd, k_inv, w_stk, v_flat, t_flat)

        y = out.reshape(B_pad, C_out, Hp, Wp)[:B, :, :H, :W]
        return y

    return forward


# ----------------------------------------------------------------------------
# Deterministic parameter initialization (matches shapes in BWTConv2D.__init__).
# ----------------------------------------------------------------------------
def init_params(key, height, width, in_channels, out_channels, pods):
    Hp = find_min_power(height)
    Wp = find_min_power(width)

    Hh_np = get_bwt_matrix(Hp) * np.sqrt(Hp)
    Hw_np = get_bwt_matrix(Wp) * np.sqrt(Wp)
    Hih_np = np.linalg.inv(Hh_np)
    Hiw_np = np.linalg.inv(Hw_np)

    kv, kw, kt = jax.random.split(key, 3)
    v = jax.random.uniform(kv, (pods, Hp, Wp), jnp.float32)            # torch.rand
    bound = 1.0 / np.sqrt(in_channels)                                 # Conv2d(k=1) default
    conv_w = jax.random.uniform(kw, (pods, out_channels, in_channels),
                                jnp.float32, minval=-bound, maxval=bound)
    threshold = jax.random.uniform(kt, (pods, Hp, Wp), jnp.float32,
                                   minval=0.0, maxval=0.1)             # nonnegative

    return {
        "H_height": jnp.asarray(Hh_np, jnp.float32),
        "H_width": jnp.asarray(Hw_np, jnp.float32),
        "H_inv_height": jnp.asarray(Hih_np, jnp.float32),
        "H_inv_width": jnp.asarray(Hiw_np, jnp.float32),
        "v": v,
        "conv_w": conv_w,
        "threshold": threshold,
    }


# ----------------------------------------------------------------------------
# Pure-JAX f32 reference (mirrors the PyTorch forward) for a sanity check.
# ----------------------------------------------------------------------------
def reference(x, params, residual=True):
    B, C, H, W = x.shape
    Hh, Hw = params["H_height"], params["H_width"]
    Hih, Hiw = params["H_inv_height"], params["H_inv_width"]
    v, conv_w, thr = params["v"], params["conv_w"], params["threshold"]
    Hp, Wp = Hh.shape[0], Hw.shape[0]

    f0 = jnp.pad(x, ((0, 0), (0, 0), (0, Hp - H), (0, Wp - W)))
    f1 = jnp.einsum("bchw,wk->bchk", f0, Hw, precision="highest")
    f2 = jnp.einsum("bchw,hk->bckw", f1, Hh, precision="highest")
    acc = 0.0
    for i in range(v.shape[0]):
        f3 = v[i][None, None] * f2
        f4 = jnp.einsum("oc,bchw->bohw", conv_w[i], f3, precision="highest")
        f5 = jnp.sign(f4) * jnp.maximum(jnp.abs(f4) - thr[i][None, None], 0.0)
        acc = acc + f5
    f7 = jnp.einsum("bchw,wk->bchk", acc, Hiw, precision="highest")
    f8 = jnp.einsum("bchw,hk->bckw", f7, Hih, precision="highest")
    y = f8[..., :H, :W]
    if residual:
        y = y + x
    return y


if __name__ == "__main__":
    B, C_in, C_out = 2, 4, 4
    H, W = 16, 16
    pods = 2

    key = jax.random.PRNGKey(0)
    kx, kp = jax.random.split(key)
    x = jax.random.normal(kx, (B, C_in, H, W), jnp.float32)
    params = init_params(kp, H, W, C_in, C_out, pods)

    forward = make_bwt_conv2d(params, residual=True)
    y = jax.block_until_ready(forward(x))

    assert y.shape == (B, C_out, H, W)
    y_ref = np.asarray(reference(x, params, residual=True))
    np.testing.assert_allclose(np.asarray(y), y_ref, rtol=5e-2, atol=5e-2)

    print("KERNEL_OK")
</pallas_src>

<mosaic_0001>
module attributes {stable_mosaic.version = 11 : i64} {
  func.func @_bwt_conv2d_kernel(%arg0: i32, %arg1: memref<8x256xf32, #tpu.memory_space<vmem>>, %arg2: memref<256x256xbf16, #tpu.memory_space<vmem>>, %arg3: memref<256x256xbf16, #tpu.memory_space<vmem>>, %arg4: memref<8x4xbf16, #tpu.memory_space<vmem>>, %arg5: memref<2x256xf32, #tpu.memory_space<vmem>>, %arg6: memref<2x256xf32, #tpu.memory_space<vmem>>, %arg7: memref<8x256xf32, #tpu.memory_space<vmem>>) attributes {dimension_semantics = [#tpu.dimension_semantics<parallel>], iteration_bounds = array<i64: 1>, scalar_prefetch = 0 : i64, scratch_operands = 0 : i64, tpu.core_type = #tpu.core_type<tc>, window_params = [{transform_indices = @transform_0, window_bounds = array<i64: 8, 256>}, {pipeline_mode = #tpu.pipeline_mode<synchronous>, transform_indices = @transform_1, window_bounds = array<i64: 256, 256>}, {pipeline_mode = #tpu.pipeline_mode<synchronous>, transform_indices = @transform_2, window_bounds = array<i64: 256, 256>}, {pipeline_mode = #tpu.pipeline_mode<synchronous>, transform_indices = @transform_3, window_bounds = array<i64: 8, 4>}, {pipeline_mode = #tpu.pipeline_mode<synchronous>, transform_indices = @transform_4, window_bounds = array<i64: 2, 256>}, {pipeline_mode = #tpu.pipeline_mode<synchronous>, transform_indices = @transform_5, window_bounds = array<i64: 2, 256>}, {transform_indices = @transform_6, window_bounds = array<i64: 8, 256>}]} {
    %c0 = arith.constant 0 : index
    %c0_0 = arith.constant 0 : index
    %0 = vector.load %arg1[%c0, %c0_0] : memref<8x256xf32, #tpu.memory_space<vmem>>, vector<8x256xf32>
    %1 = arith.truncf %0 : vector<8x256xf32> to vector<8x256xbf16>
    %c0_1 = arith.constant 0 : index
    %c0_2 = arith.constant 0 : index
    %2 = vector.load %arg2[%c0_1, %c0_2] : memref<256x256xbf16, #tpu.memory_space<vmem>>, vector<256x256xbf16>
    %cst = arith.constant dense<0.000000e+00> : vector<8x256xf32>
    %3 = tpu.matmul %1, %2, %cst {dimension_numbers = #tpu.dot_dimension_numbers<[1], [0], [0], [1], [0, 0, 1, 1], [], []>} : vector<8x256xbf16>, vector<256x256xbf16>, vector<8x256xf32> -> vector<8x256xf32>
    %c0_3 = arith.constant 0 : index
    %c0_4 = arith.constant 0 : index
    %4 = vector.load %arg4[%c0_3, %c0_4] : memref<8x4xbf16, #tpu.memory_space<vmem>>, vector<8x4xbf16>
    %5 = vector.shape_cast %4 : vector<8x4xbf16> to vector<1x8x4xbf16>
    %6 = vector.broadcast %5 : vector<1x8x4xbf16> to vector<2x8x4xbf16>
    %7 = arith.truncf %3 : vector<8x256xf32> to vector<8x256xbf16>
    %8 = vector.shape_cast %7 : vector<8x256xbf16> to vector<2x4x256xbf16>
    "tpu.trace_start"() <{level = 10 : i32, message = "boc,bcs->bos"}> : () -> ()
    %cst_5 = arith.constant dense<0.000000e+00> : vector<2x8x256xf32>
    %9 = tpu.matmul %6, %8, %cst_5 {dimension_numbers = #tpu.dot_dimension_numbers<[2], [1], [1], [2], [0, 0, 0, 1, 1, 2], [0], [0]>} : vector<2x8x4xbf16>, vector<2x4x256xbf16>, vector<2x8x256xf32> -> vector<2x8x256xf32>
    "tpu.trace_stop"() : () -> ()
    %c0_6 = arith.constant 0 : index
    %c0_7 = arith.constant 0 : index
    %10 = vector.load %arg5[%c0_6, %c0_7] : memref<2x256xf32, #tpu.memory_space<vmem>>, vector<1x256xf32>
    %11 = vector.shape_cast %10 : vector<1x256xf32> to vector<1x1x256xf32>
    %c0_8 = arith.constant 0 : index
    %c0_9 = arith.constant 0 : index
    %12 = vector.load %arg6[%c0_8, %c0_9] : memref<2x256xf32, #tpu.memory_space<vmem>>, vector<1x256xf32>
    %13 = vector.shape_cast %12 : vector<1x256xf32> to vector<1x1x256xf32>
    %14 = vector.extract_strided_slice %9 {offsets = [0, 0, 0], sizes = [2, 4, 256], strides = [1, 1, 1]} : vector<2x8x256xf32> to vector<2x4x256xf32>
    %15 = vector.broadcast %11 : vector<1x1x256xf32> to vector<2x4x256xf32>
    %16 = arith.mulf %14, %15 : vector<2x4x256xf32>
    %cst_10 = arith.constant 0.000000e+00 : f32
    %17 = vector.broadcast %cst_10 : f32 to vector<1x1x256xf32>
    %18 = arith.subf %17, %13 : vector<1x1x256xf32>
    %19 = vector.broadcast %18 : vector<1x1x256xf32> to vector<2x4x256xf32>
    %20 = arith.maximumf %19, %16 : vector<2x4x256xf32>
    %21 = vector.broadcast %13 : vector<1x1x256xf32> to vector<2x4x256xf32>
    %22 = arith.minimumf %21, %20 : vector<2x4x256xf32>
    %23 = arith.subf %16, %22 : vector<2x4x256xf32>
    %c1 = arith.constant 1 : index
    %c0_11 = arith.constant 0 : index
    %24 = vector.load %arg5[%c1, %c0_11] : memref<2x256xf32, #tpu.memory_space<vmem>>, vector<1x256xf32>
    %25 = vector.shape_cast %24 : vector<1x256xf32> to vector<1x1x256xf32>
    %c1_12 = arith.constant 1 : index
    %c0_13 = arith.constant 0 : index
    %26 = vector.load %arg6[%c1_12, %c0_13] : memref<2x256xf32, #tpu.memory_space<vmem>>, vector<1x256xf32>
    %27 = vector.shape_cast %26 : vector<1x256xf32> to vector<1x1x256xf32>
    %28 = vector.extract_strided_slice %9 {offsets = [0, 4, 0], sizes = [2, 4, 256], strides = [1, 1, 1]} : vector<2x8x256xf32> to vector<2x4x256xf32>
    %29 = vector.broadcast %25 : vector<1x1x256xf32> to vector<2x4x256xf32>
    %30 = arith.mulf %28, %29 : vector<2x4x256xf32>
    %cst_14 = arith.constant 0.000000e+00 : f32
    %31 = vector.broadcast %cst_14 : f32 to vector<1x1x256xf32>
    %32 = arith.subf %31, %27 : vector<1x1x256xf32>
    %33 = vector.broadcast %32 : vector<1x1x256xf32> to vector<2x4x256xf32>
    %34 = arith.maximumf %33, %30 : vector<2x4x256xf32>
    %35 = vector.broadcast %27 : vector<1x1x256xf32> to vector<2x4x256xf32>
    %36 = arith.minimumf %35, %34 : vector<2x4x256xf32>
    %37 = arith.subf %30, %36 : vector<2x4x256xf32>
    %38 = arith.addf %23, %37 : vector<2x4x256xf32>
    %39 = vector.shape_cast %38 : vector<2x4x256xf32> to vector<8x256xf32>
    %40 = arith.truncf %39 : vector<8x256xf32> to vector<8x256xbf16>
    %c0_15 = arith.constant 0 : index
    %c0_16 = arith.constant 0 : index
    %41 = vector.load %arg3[%c0_15, %c0_16] : memref<256x256xbf16, #tpu.memory_space<vmem>>, vector<256x256xbf16>
    %cst_17 = arith.constant dense<0.000000e+00> : vector<8x256xf32>
    %42 = tpu.matmul %40, %41, %cst_17 {dimension_numbers = #tpu.dot_dimension_numbers<[1], [0], [0], [1], [0, 0, 1, 1], [], []>} : vector<8x256xbf16>, vector<256x256xbf16>, vector<8x256xf32> -> vector<8x256xf32>
    %43 = arith.addf %42, %0 : vector<8x256xf32>
    %c0_18 = arith.constant 0 : index
    %c0_19 = arith.constant 0 : index
    %44 = vector.load %arg7[%c0_18, %c0_19] : memref<8x256xf32, #tpu.memory_space<vmem>>, vector<8x256xf32>
    tpu.vector_store %arg7[%c0_18, %c0_19], %43 {strides = array<i32>} : memref<8x256xf32, #tpu.memory_space<vmem>>, vector<8x256xf32>,
    return
  }
  func.func @transform_0(%arg0: i32) -> (i32, i32) {
    %c0_i32 = arith.constant 0 : i32
    %c0_i32_0 = arith.constant 0 : i32
    return %arg0, %c0_i32 : i32, i32
  }
  func.func @transform_1(%arg0: i32) -> (i32, i32) {
    %c0_i32 = arith.constant 0 : i32
    %c0_i32_0 = arith.constant 0 : i32
    %c0_i32_1 = arith.constant 0 : i32
    return %c0_i32, %c0_i32_0 : i32, i32
  }
  func.func @transform_2(%arg0: i32) -> (i32, i32) {
    %c0_i32 = arith.constant 0 : i32
    %c0_i32_0 = arith.constant 0 : i32
    %c0_i32_1 = arith.constant 0 : i32
    return %c0_i32, %c0_i32_0 : i32, i32
  }
  func.func @transform_3(%arg0: i32) -> (i32, i32) {
    %c0_i32 = arith.constant 0 : i32
    %c0_i32_0 = arith.constant 0 : i32
    %c0_i32_1 = arith.constant 0 : i32
    return %c0_i32, %c0_i32_0 : i32, i32
  }
  func.func @transform_4(%arg0: i32) -> (i32, i32) {
    %c0_i32 = arith.constant 0 : i32
    %c0_i32_0 = arith.constant 0 : i32
    %c0_i32_1 = arith.constant 0 : i32
    return %c0_i32, %c0_i32_0 : i32, i32
  }
  func.func @transform_5(%arg0: i32) -> (i32, i32) {
    %c0_i32 = arith.constant 0 : i32
    %c0_i32_0 = arith.constant 0 : i32
    %c0_i32_1 = arith.constant 0 : i32
    return %c0_i32, %c0_i32_0 : i32, i32
  }
  func.func @transform_6(%arg0: i32) -> (i32, i32) {
    %c0_i32 = arith.constant 0 : i32
    %c0_i32_0 = arith.constant 0 : i32
    return %arg0, %c0_i32 : i32, i32
  }
}

</mosaic_0001>

<bundles_post_ra>
// kernel: forward.1
= control target key start
LH: loop header
LB: loop body
LE: loop exit
PB: predicated region body
PF: predicated region fallthrough
CT: control target
= control target key end

     0   :  { %v934_v36 = vmov 0   ;;  %v935_v37 = vmov 1983009808   ;;  %v270_v39 = vlaneseq  ;;  %vm287_vm0 = vcmask 1041408   ;;  %s1205_s1 = inlined_call_operand.vmem [shape: bf16[256,256], index: 1, kind: input, shape index: {}]   ;;  %s1206_s0 = inlined_call_operand.vmem [shape: f32[8,256], index: 0, kind: input, shape index: {}]   ;;  %s1207_s2 = inlined_call_operand.vmem [shape: bf16[256,256], index: 2, kind: input, shape index: {}]   ;;  %s1208_s3 = inlined_call_operand.vmem [shape: bf16[8,4], index: 3, kind: input, shape index: {}]   ;;  %s1209_s5 = inlined_call_operand.vmem [shape: f32[2,256], index: 5, kind: input, shape index: {}]   ;;  %s1210_s4 = inlined_call_operand.vmem [shape: f32[2,256], index: 4, kind: input, shape index: {}]   ;;  %s1211_s6 = inlined_call_operand.vmem [shape: f32[8,256], index: 6, kind: output, shape index: {}]  }
   0x1   :  { %v838_v0 = vld [vmem:[%s1205_s1 + $0x4] ss:$8 sps:$4 sm:$0xff]   ;;  %v840_v1 = vld [vmem:[%s1205_s1] ss:$8 sps:$4 sm:$0xff]   ;;  %v841_v2 = vld [vmem:[%s1205_s1 + $0x14] ss:$8 sps:$4 sm:$0xff]   ;;  %381 = vmatprep.mubr.bf16.mxu1 %v934_v36  ;;  %v268_v38 = vunpack.c.l.s4 %v935_v37 }
   0x2   :  { %220 = vmatprep.subr.bf16.mxu0 %v838_v0  ;;  %v843_v3 = vld [vmem:[%s1205_s1 + $0x10] ss:$8 sps:$4 sm:$0xff]   ;;  %v844_v4 = vld [vmem:[%s1205_s1 + $0x24] ss:$8 sps:$4 sm:$0xff]   ;;  %v846_v5 = vld [vmem:[%s1205_s1 + $0x20] ss:$8 sps:$4 sm:$0xff]  }
   0x3   :  { %221 = vmatpush1.bf16.msra.mxu0 %v840_v1  ;;  %v847_v6 = vld [vmem:[%s1205_s1 + $0x34] ss:$8 sps:$4 sm:$0xff]   ;;  %v849_v7 = vld [vmem:[%s1205_s1 + $0x30] ss:$8 sps:$4 sm:$0xff]   ;;  %v850_v8 = vld [vmem:[%s1205_s1 + $0x44] ss:$8 sps:$4 sm:$0xff]   ;;  %v269_v40 = vunpack.c.0.s8 %v268_v38 }
   0x4   :  { %222 = vmatprep.subr.bf16.mxu0 %v841_v2  ;;  %v852_v9 = vld [vmem:[%s1205_s1 + $0x40] ss:$8 sps:$4 sm:$0xff]   ;;  %v853_v10 = vld [vmem:[%s1205_s1 + $0x54] ss:$8 sps:$4 sm:$0xff]   ;;  %v855_v11 = vld [vmem:[%s1205_s1 + $0x50] ss:$8 sps:$4 sm:$0xff]  }
   0x5   :  { %v856_v12 = vld [vmem:[%s1205_s1 + $0x64] ss:$8 sps:$4 sm:$0xff]   ;;  %v858_v15 = vld [vmem:[%s1205_s1 + $0x60] ss:$8 sps:$4 sm:$0xff]   ;;  %v859_v16 = vld [vmem:[%s1205_s1 + $0x74] ss:$8 sps:$4 sm:$0xff]  }
   0x6   :  { %v1013_v13 = vld [vmem:[%s1206_s0 + $0x8] sm:$0xff]  ;;  %v861_v17 = vld [vmem:[%s1205_s1 + $0x70] ss:$8 sps:$4 sm:$0xff]   ;;  %v865_v20 = vld [vmem:[%s1205_s1 + $0x94] ss:$8 sps:$4 sm:$0xff]   ;;  %v1081_v41 = vshrl.u32 %v270_v39, 7 }
   0x7   :  { %223 = vmatpush1.bf16.msra.mxu0 %v843_v3  ;;  %v27_v14 = vpack.c.bf16 %v1013_v13, %v1013_v13  ;;  %v862_v18 = vld [vmem:[%s1205_s1 + $0x84] ss:$8 sps:$4 sm:$0xff]   ;;  %v864_v19 = vld [vmem:[%s1205_s1 + $0x80] ss:$8 sps:$4 sm:$0xff]   ;;  %v867_v21 = vld [vmem:[%s1205_s1 + $0x90] ss:$8 sps:$4 sm:$0xff]  }
   0x8   :  { %224 = vmatprep.subr.bf16.mxu0 %v844_v4  ;;  %v868_v22 = vld [vmem:[%s1205_s1 + $0xa4] ss:$8 sps:$4 sm:$0xff]   ;;  %v870_v23 = vld [vmem:[%s1205_s1 + $0xa0] ss:$8 sps:$4 sm:$0xff]   ;;  %v871_v24 = vld [vmem:[%s1205_s1 + $0xb4] ss:$8 sps:$4 sm:$0xff]   ;;  %v272_v43 = vsub.s32 %v269_v40, %v1081_v41 }
   0x9   :  { %252 = vmatprep.mubr.bf16.mxu0 %v27_v14  ;;  %v873_v25 = vld [vmem:[%s1205_s1 + $0xb0] ss:$8 sps:$4 sm:$0xff]   ;;  %v874_v26 = vld [vmem:[%s1205_s1 + $0xc4] ss:$8 sps:$4 sm:$0xff]   ;;  %v876_v27 = vld [vmem:[%s1205_s1 + $0xc0] ss:$8 sps:$4 sm:$0xff]  }
   0xa   :  { %v877_v28 = vld [vmem:[%s1205_s1 + $0xd4] ss:$8 sps:$4 sm:$0xff]   ;;  %v879_v29 = vld [vmem:[%s1205_s1 + $0xd0] ss:$8 sps:$4 sm:$0xff]   ;;  %v880_v30 = vld [vmem:[%s1205_s1 + $0xe4] ss:$8 sps:$4 sm:$0xff]  }
   0xb   :  { %225 = vmatpush1.bf16.msra.mxu0 %v846_v5  ;;  %v882_v31 = vld [vmem:[%s1205_s1 + $0xe0] ss:$8 sps:$4 sm:$0xff]   ;;  %v883_v32 = vld [vmem:[%s1205_s1 + $0xf4] ss:$8 sps:$4 sm:$0xff]   ;;  %v885_v33 = vld [vmem:[%s1205_s1 + $0xf0] ss:$8 sps:$4 sm:$0xff]  }
   0xc   :  { %226 = vmatprep.subr.bf16.mxu0 %v847_v6  ;;  %v1077_v34 = vld [vmem:[%s1206_s0] sm:$0xff]  ;;  %vm283_vm1 = vcmask 31744   ;;  %v891_v59 = vld [vmem:[%s1207_s2 + $0x14] ss:$8 sps:$4 sm:$0xff]   ;;  %v889_v60 = vld [vmem:[%s1207_s2 + $0x10] ss:$8 sps:$4 sm:$0xff]  }
   0xd   :  { %v26_v35 = vpack.c.bf16 %v1077_v34, %v1077_v34  ;;  %v888_v55 = vld [vmem:[%s1207_s2 + $0x4] ss:$8 sps:$4 sm:$0xff]   ;;  %v261_v56 = vld [vmem:[%s1208_s3] sm:$0xf]  ;;  %v897_v63 = vld [vmem:[%s1207_s2 + $0x34] ss:$8 sps:$4 sm:$0xff]  }
   0xe   :  { %v886_v58 = vld [vmem:[%s1207_s2] ss:$8 sps:$4 sm:$0xff]   ;;  %v894_v61 = vld [vmem:[%s1207_s2 + $0x24] ss:$8 sps:$4 sm:$0xff]   ;;  %v895_v0 = vld [vmem:[%s1207_s2 + $0x30] ss:$8 sps:$4 sm:$0xff]  }
   0xf   :  { %227 = vmatpush1.bf16.msra.mxu0 %v849_v7  ;;  %v892_v62 = vld [vmem:[%s1207_s2 + $0x20] ss:$8 sps:$4 sm:$0xff]   ;;  %v900_v1 = vld [vmem:[%s1207_s2 + $0x44] ss:$8 sps:$4 sm:$0xff]   ;;  %v903_v3 = vld [vmem:[%s1207_s2 + $0x54] ss:$8 sps:$4 sm:$0xff]  }
  0x10   :  { %228 = vmatprep.subr.bf16.mxu0 %v850_v8  ;;  %v898_v2 = vld [vmem:[%s1207_s2 + $0x40] ss:$8 sps:$4 sm:$0xff]   ;;  %v901_v4 = vld [vmem:[%s1207_s2 + $0x50] ss:$8 sps:$4 sm:$0xff]   ;;  %v906_v5 = vld [vmem:[%s1207_s2 + $0x64] ss:$8 sps:$4 sm:$0xff]  }
  0x11   :  { %v904_v6 = vld [vmem:[%s1207_s2 + $0x60] ss:$8 sps:$4 sm:$0xff]   ;;  %v909_v7 = vld [vmem:[%s1207_s2 + $0x74] ss:$8 sps:$4 sm:$0xff]   ;;  %v907_v8 = vld [vmem:[%s1207_s2 + $0x70] ss:$8 sps:$4 sm:$0xff]  }
  0x12   :  { %v918_v14 = vld [vmem:[%s1207_s2 + $0xa4] ss:$8 sps:$4 sm:$0xff]  }
  0x13   :  { %229 = vmatpush1.bf16.msra.mxu0 %v852_v9  ;;  %v912_v9 = vld [vmem:[%s1207_s2 + $0x84] ss:$8 sps:$4 sm:$0xff]  }
  0x14   :  { %230 = vmatprep.subr.bf16.mxu0 %v853_v10  ;;  %v910_v10 = vld [vmem:[%s1207_s2 + $0x80] ss:$8 sps:$4 sm:$0xff]  }
  0x17   :  { %231 = vmatpush1.bf16.msra.mxu0 %v855_v11  ;;  %v915_v11 = vld [vmem:[%s1207_s2 + $0x94] ss:$8 sps:$4 sm:$0xff]  }
  0x18   :  { %232 = vmatprep.subr.bf16.mxu0 %v856_v12  ;;  %v913_v12 = vld [vmem:[%s1207_s2 + $0x90] ss:$8 sps:$4 sm:$0xff]  }
  0x1b   :  { %233 = vmatpush1.bf16.msra.mxu0 %v858_v15  ;;  %v916_v15 = vld [vmem:[%s1207_s2 + $0xa0] ss:$8 sps:$4 sm:$0xff]  }
  0x1c   :  { %234 = vmatprep.subr.bf16.mxu0 %v859_v16  ;;  %v921_v16 = vld [vmem:[%s1207_s2 + $0xb4] ss:$8 sps:$4 sm:$0xff]  }
  0x1f   :  { %235 = vmatpush1.bf16.msra.mxu0 %v861_v17  ;;  %v919_v17 = vld [vmem:[%s1207_s2 + $0xb0] ss:$8 sps:$4 sm:$0xff]  }
  0x20   :  { %236 = vmatprep.subr.bf16.mxu0 %v862_v18  ;;  %v924_v18 = vld [vmem:[%s1207_s2 + $0xc4] ss:$8 sps:$4 sm:$0xff]  }
  0x23   :  { %237 = vmatpush1.bf16.msra.mxu0 %v864_v19  ;;  %v922_v19 = vld [vmem:[%s1207_s2 + $0xc0] ss:$8 sps:$4 sm:$0xff]  }
  0x24   :  { %238 = vmatprep.subr.bf16.mxu0 %v865_v20  ;;  %v927_v20 = vld [vmem:[%s1207_s2 + $0xd4] ss:$8 sps:$4 sm:$0xff]  }
  0x27   :  { %239 = vmatpush1.bf16.msra.mxu0 %v867_v21  ;;  %v925_v21 = vld [vmem:[%s1207_s2 + $0xd0] ss:$8 sps:$4 sm:$0xff]  }
  0x28   :  { %240 = vmatprep.subr.bf16.mxu0 %v868_v22  ;;  %v930_v22 = vld [vmem:[%s1207_s2 + $0xe4] ss:$8 sps:$4 sm:$0xff]  }
  0x2b   :  { %241 = vmatpush1.bf16.msra.mxu0 %v870_v23  ;;  %v928_v23 = vld [vmem:[%s1207_s2 + $0xe0] ss:$8 sps:$4 sm:$0xff]  }
  0x2c   :  { %242 = vmatprep.subr.bf16.mxu0 %v871_v24  ;;  %v931_v24 = vld [vmem:[%s1207_s2 + $0xf0] ss:$8 sps:$4 sm:$0xff]  }
  0x2f   :  { %243 = vmatpush1.bf16.msra.mxu0 %v873_v25  ;;  %v933_v25 = vld [vmem:[%s1207_s2 + $0xf4] ss:$8 sps:$4 sm:$0xff]  }
  0x30   :  { %244 = vmatprep.subr.bf16.mxu0 %v874_v26  ;;  %v391_v26 = vld [vmem:[%s1209_s5] ss:$2 sm:$0x3] }
  0x33   :  { %245 = vmatpush1.bf16.msra.mxu0 %v876_v27  ;;  %v801_v27 = vld [vmem:[%s1209_s5 + $0x1] ss:$2 sm:$0x3] }
  0x34   :  { %246 = vmatprep.subr.bf16.mxu0 %v877_v28  ;;  %v395_v28 = vsub.s32 0, %v1081_v41 }
  0x37   :  { %247 = vmatpush1.bf16.msra.mxu0 %v879_v29  ;;  %v399_v29 = vsub.s32 1, %v1081_v41 }
  0x38   :  { %248 = vmatprep.subr.bf16.mxu0 %v880_v30  ;;  %v390_v30 = vld [vmem:[%s1210_s4] ss:$2 sm:$0x3] }
  0x39   :  { %v400_v37 = vrot.slane %v390_v30, %v399_v29 }
  0x3b   :  { %249 = vmatpush1.bf16.msra.mxu0 %v882_v31  ;;  %v800_v31 = vld [vmem:[%s1210_s4 + $0x1] ss:$2 sm:$0x3] }
  0x3c   :  { %250 = vmatprep.subr.bf16.mxu0 %v883_v32  ;;  %v407_v32 = vsub.f32 0.0, %v391_v26  ;;  %v454_v38 = vrot.slane %v800_v31, %v399_v29 }
  0x3e   :  { %v412_v39 = vrot.slane %v407_v32, %v395_v28 }
  0x3f   :  { %251 = vmatpush1.bf16.msra.mxu0 %v885_v33  ;;  %v461_v33 = vsub.f32 0.0, %v801_v27 }
  0x41   :  { %v466_v40 = vrot.slane %v461_v33, %v395_v28 }
  0x42   :  { %253 = vmatmul.mubr.bf16.vlgmr.msra.gmra.mrb[0].mxu0 %v26_v35  ;;  %v396_v35 = vrot.slane %v390_v30, %v395_v28 }
  0x43   :  { %326 = vmatprep.mubr.bf16.mxu0 %v934_v36  ;;  %v450_v36 = vrot.slane %v800_v31, %v395_v28 }
 0x115   :  { %v254_v42 = vpop.f32.mrb[0].mxu0 }
 0x116   :  { %v256_v44 = vpop.f32.mrb[1].mxu0 }
 0x117   :  { %v795_v45 = vpack.c.bf16 %v256_v44, %v254_v42  ;;  %v258_v46 = vpop.f32.mrb[2].mxu0  ;;  %v470_v44 = vrot.slane %v461_v33, %v399_v29 }
 0x118   :  { %v259_v47 = vpop.f32.mrb[3].mxu0 }
 0x119   :  { %v273_v48 = vrot.slane %v795_v45, %v272_v43  ;;  %v427_v45 = vrot.slane %v391_v26, %v395_v28  ;;  %v481_v47 = vrot.slane %v801_v27, %v395_v28 }
 0x11b   :  { %v274_v49 = vcombine.high %v273_v48, %v273_v48  ;;  %v281_v50 = vrot.slane %v273_v48, %v272_v43 }
 0x11d   :  { %v282_v51 = vcombine.high %v281_v50, %v281_v50  ;;  %v341_v52 = vrot.slane %v274_v49, %v272_v43  ;;  %v289_v53 = vsel %vm287_vm0, %v281_v50, 0  ;;  %v416_v43 = vrot.slane %v407_v32, %v399_v29 }
 0x11e   :  { %v431_v50 = vrot.slane %v391_v26, %v399_v29 }
 0x11f   :  { %796 = vmatprep.subr.msk.bf16.mxu0 %vm287_vm0, %v282_v51  ;;  %v342_v54 = vcombine.high %v341_v52, %v341_v52  ;;  %v344_v57 = vsel %vm287_vm0, %v341_v52, 0  ;;  %v485_v52 = vrot.slane %v801_v27, %v399_v29 }
 0x120   :  { %295 = vmatpush1.bf16.msra.mxu0 %v289_v53 }
 0x121   :  { %798 = vmatprep.subr.msk.bf16.mxu1 %vm287_vm0, %v342_v54 }
 0x122   :  { %350 = vmatpush1.bf16.msra.mxu1 %v344_v57 }
 0x123   :  { %797 = vmatmul.mubr.msk.bf16.vlgmr.msra.gmra.mrb[4].mxu0 %vm283_vm1, %v261_v56  ;;  %716 = vmatprep.subr.bf16.mxu1 %v888_v55 }
 0x125   :  { %799 = vmatmul.mubr.msk.bf16.vlgmr.msra.gmra.mrb[0].mxu1 %vm283_vm1, %v261_v56 }
 0x126   :  { %717 = vmatpush1.bf16.msra.mxu1 %v886_v58 }
 0x127   :  { %718 = vmatprep.subr.bf16.mxu1 %v891_v59 }
 0x12a   :  { %719 = vmatpush1.bf16.msra.mxu1 %v889_v60 }
 0x12b   :  { %720 = vmatprep.subr.bf16.mxu1 %v894_v61 }
 0x12e   :  { %721 = vmatpush1.bf16.msra.mxu1 %v892_v62 }
 0x12f   :  { %722 = vmatprep.subr.bf16.mxu1 %v897_v63 }
 0x132   :  { %723 = vmatpush1.bf16.msra.mxu1 %v895_v0 }
 0x133   :  { %724 = vmatprep.subr.bf16.mxu1 %v900_v1 }
 0x136   :  { %725 = vmatpush1.bf16.msra.mxu1 %v898_v2 }
 0x137   :  { %726 = vmatprep.subr.bf16.mxu1 %v903_v3 }
 0x13a   :  { %727 = vmatpush1.bf16.msra.mxu1 %v901_v4 }
 0x13b   :  { %728 = vmatprep.subr.bf16.mxu1 %v906_v5 }
 0x13e   :  { %729 = vmatpush1.bf16.msra.mxu1 %v904_v6 }
 0x13f   :  { %730 = vmatprep.subr.bf16.mxu1 %v909_v7 }
 0x142   :  { %731 = vmatpush1.bf16.msra.mxu1 %v907_v8 }
 0x143   :  { %732 = vmatprep.subr.bf16.mxu1 %v912_v9 }
 0x146   :  { %733 = vmatpush1.bf16.msra.mxu1 %v910_v10 }
 0x147   :  { %734 = vmatprep.subr.bf16.mxu1 %v915_v11 }
 0x14a   :  { %735 = vmatpush1.bf16.msra.mxu1 %v913_v12 }
 0x14b   :  { %736 = vmatprep.subr.bf16.mxu1 %v918_v14 }
 0x14e   :  { %737 = vmatpush1.bf16.msra.mxu1 %v916_v15 }
 0x14f   :  { %738 = vmatprep.subr.bf16.mxu1 %v921_v16 }
 0x152   :  { %739 = vmatpush1.bf16.msra.mxu1 %v919_v17 }
 0x153   :  { %740 = vmatprep.subr.bf16.mxu1 %v924_v18 }
 0x156   :  { %741 = vmatpush1.bf16.msra.mxu1 %v922_v19 }
 0x157   :  { %742 = vmatprep.subr.bf16.mxu1 %v927_v20 }
 0x15a   :  { %743 = vmatpush1.bf16.msra.mxu1 %v925_v21 }
 0x15b   :  { %744 = vmatprep.subr.bf16.mxu1 %v930_v22 }
 0x15e   :  { %745 = vmatpush1.bf16.msra.mxu1 %v928_v23 }
 0x15f   :  { %746 = vmatprep.subr.bf16.mxu1 %v933_v25 }
 0x162   :  { %747 = vmatpush1.bf16.msra.mxu1 %v931_v24 }
 0x1f6   :  { %v328_v42 = vpop.f32.mrb[4].mxu0 }
 0x1f7   :  { %v403_v41 = vmul.f32 %v396_v35, %v328_v42  ;;  %v457_v46 = vmul.f32 %v450_v36, %v328_v42  ;;  %v330_v48 = vpop.f32.mrb[5].mxu0 }
 0x1f8   :  { %v404_v49 = vmul.f32 %v400_v37, %v330_v48  ;;  %v458_v51 = vmul.f32 %v454_v38, %v330_v48  ;;  %v383_v53 = vpop.f32.mrb[0].mxu1  ;;  %v332_v54 = vpop.f32.mrb[6].mxu0 }
 0x1f9   :  { %v419_v55 = vmax.f32 %v412_v39, %v403_v41  ;;  %v473_v56 = vmax.f32 %v466_v40, %v457_v46  ;;  %v405_v57 = vmul.f32 %v396_v35, %v383_v53  ;;  %v459_v58 = vmul.f32 %v450_v36, %v383_v53  ;;  %v385_v59 = vpop.f32.mrb[1].mxu1  ;;  %v333_v60 = vpop.f32.mrb[7].mxu0 }
 0x1fa   :  { %v420_v61 = vmax.f32 %v416_v43, %v404_v49  ;;  %v474_v62 = vmax.f32 %v470_v44, %v458_v51  ;;  %v406_v63 = vmul.f32 %v400_v37, %v385_v59  ;;  %v460_v0 = vmul.f32 %v454_v38, %v385_v59  ;;  %v387_v1 = vpop.f32.mrb[2].mxu1 }
 0x1fb   :  { %v434_v2 = vmin.f32 %v427_v45, %v419_v55  ;;  %v488_v3 = vmin.f32 %v481_v47, %v473_v56  ;;  %v421_v4 = vmax.f32 %v412_v39, %v405_v57  ;;  %v475_v5 = vmax.f32 %v466_v40, %v459_v58  ;;  %v388_v6 = vpop.f32.mrb[3].mxu1 }
 0x1fc   :  { %v435_v7 = vmin.f32 %v431_v50, %v420_v61  ;;  %v489_v8 = vmin.f32 %v485_v52, %v474_v62  ;;  %v422_v9 = vmax.f32 %v416_v43, %v406_v63  ;;  %v476_v10 = vmax.f32 %v470_v44, %v460_v0 }
 0x1fd   :  { %v438_v11 = vsub.f32 %v403_v41, %v434_v2  ;;  %v492_v12 = vsub.f32 %v457_v46, %v488_v3  ;;  %v436_v14 = vmin.f32 %v427_v45, %v421_v4  ;;  %v490_v15 = vmin.f32 %v481_v47, %v475_v5 }
 0x1fe   :  { %v439_v16 = vsub.f32 %v404_v49, %v435_v7  ;;  %v493_v17 = vsub.f32 %v458_v51, %v489_v8  ;;  %v437_v18 = vmin.f32 %v431_v50, %v422_v9  ;;  %v491_v19 = vmin.f32 %v485_v52, %v476_v10 }
 0x1ff   :  { %v500_v20 = vrot.slane %v492_v12, 4  ;;  %v440_v21 = vsub.f32 %v405_v57, %v436_v14  ;;  %v494_v22 = vsub.f32 %v459_v58, %v490_v15 }
 0x200   :  { %v501_v23 = vrot.slane %v493_v17, 4  ;;  %v441_v24 = vsub.f32 %v406_v63, %v437_v18  ;;  %v495_v25 = vsub.f32 %v460_v0, %v491_v19 }
 0x201   :  { %v508_v26 = vadd.f32 %v500_v20, %v438_v11  ;;  %v502_v27 = vrot.slane %v494_v22, 4 }
 0x202   :  { %v509_v28 = vadd.f32 %v501_v23, %v439_v16  ;;  %v503_v29 = vrot.slane %v495_v25, 4 }
 0x203   :  { %v510_v30 = vadd.f32 %v502_v27, %v440_v21 }
 0x204   :  { %v511_v31 = vadd.f32 %v503_v29, %v441_v24 }
 0x205   :  { %v802_v32 = vcombine.low %v508_v26, %v510_v30 }
 0x206   :  { %v803_v33 = vcombine.low %v509_v28, %v511_v31 }
 0x207   :  { %v522_v36 = vpack.c.bf16 %v802_v32, %v802_v32 }
 0x208   :  { %v523_v35 = vpack.c.bf16 %v803_v33, %v803_v33 }
 0x20a   :  { %748 = vmatprep.mubr.bf16.mxu1 %v523_v35 }
 0x20b   :  { %749 = vmatmul.mubr.bf16.vlgmr.msra.gmra.mrb[4].mxu1 %v522_v36 }
 0x2de   :  { %v750_v37 = vpop.f32.mrb[4].mxu1 }
 0x2df   :  { %v751_v38 = vadd.f32 %v750_v37, %v1077_v34  ;;  %v752_v39 = vpop.f32.mrb[5].mxu1 }
 0x2e0   :  { %v753_v40 = vadd.f32 %v752_v39, %v1013_v13  ;;  %v754_v42 = vpop.f32.mrb[6].mxu1 }
 0x2e1   :  { %757 = vst [vmem:[%s1211_s6] sm:$0xff] %v751_v38  ;;  %v755_v43 = vpop.f32.mrb[7].mxu1 }
 0x2e2   :  { %758 = vst [vmem:[%s1211_s6 + $0x8] sm:$0xff] %v753_v40 }

</bundles_post_ra>
